<compile_context>
chip_gen: v7x
topology: tpu7x:2x2x1
jax: 0.10.0
libtpu: 0.0.40
codegen_flags: <defaults>
</compile_context>

<pallas_src>
import functools
import math

import jax
import jax.numpy as jnp
from jax.experimental import pallas as pl
from jax.experimental.pallas import tpu as pltpu


def _conv_block_kernel(x_ref, w_ref, b_ref, o_ref, acc_ref, *, TH, W, K, scale):
    # Layout: NHWC inside the kernel (channels on the 128-lane axis).
    #   x_ref  : (TH + K - 1, W + K - 1, Cin)   halo'd, spatially pre-padded row tile
    #   w_ref  : (K*K, Cin, Cout_p)             conv weights, taps on the leading axis
    #   b_ref  : (1, Cout_p)                    WScaleLayer bias (zero-padded to Cout_p)
    #   o_ref  : (TH, W, Cout_p)                output row tile, Cout_p % 128 == 0
    #   acc_ref: (TH*W, Cout_p) f32             VMEM scratch accumulator
    cin = x_ref.shape[-1]
    cout_p = o_ref.shape[-1]
    x = x_ref[...]

    acc_ref[...] = jnp.zeros_like(acc_ref)

    # Convolution as K*K shifted (TH*W, Cin) @ (Cin, Cout_p) MXU matmuls accumulated in
    # VMEM (keeps the f32 accumulator out of vregs across the unrolled tap loop).
    # Default matmul precision: no HIGHEST -> single-pass MXU.
    # TODO(synk): fold the K*K taps into the contraction (in-VMEM im2col giving one
    # (TH*W, K*K*Cin) @ (K*K*Cin, Cout_p) matmul) once the unaligned lane-concat /
    # masked lane-store path is verified on the target Mosaic version; for realistic
    # Cin >= 128 the contraction is already MXU-wide, so this matters mainly for
    # small-Cin configs like the test shape.
    for ky in range(K):
        for kx in range(K):
            patch = x[ky:ky + TH, kx:kx + W, :].reshape(TH * W, cin)
            acc_ref[...] += jnp.dot(patch, w_ref[ky * K + kx],
                                    preferred_element_type=jnp.float32)

    # WScaleLayer (scale + bias) fused with LeakyReLU(0.2); lane-dense full-block store.
    y = acc_ref[...] * scale + b_ref[...]
    y = jnp.where(y >= 0, y, 0.2 * y)
    o_ref[...] = y.reshape(TH, W, cout_p).astype(o_ref.dtype)


def conv_block_forward(x_nchw, weight_oihw, bias, *, wscale_gain=math.sqrt(2.0)):
    """ConvBlock forward (default config). PyTorch NCHW / OIHW at the interface; the
    Pallas kernel itself runs in NHWC with Cout zero-padded up to a multiple of 128."""
    N, Cin, H, W = x_nchw.shape
    Cout, _, K, _ = weight_oihw.shape
    scale = wscale_gain / math.sqrt(Cin * K * K)
    pad = (K - 1) // 2
    Hp, Wp = H + 2 * pad, W + 2 * pad

    LANES = 128
    Cout_p = ((Cout + LANES - 1) // LANES) * LANES

    # Output-row tile height. 8 rows keeps the per-step VMEM footprint small
    # (2*(input tile + output tile) + weights + f32 accumulator stays well under the
    # 64 MiB VMEM of v7x even at W=256, Cin=512) while giving N * H/TH parallel grid
    # points for megacore / 2-TC sharding. Raise TH toward the VMEM budget for very
    # small-channel configs if per-step overhead ever dominates.
    TH = 8 if H % 8 == 0 else H
    nR = H // TH
    THp = TH + 2 * pad

    # ---- glue (plain JAX): layout conversion, zero-padding, halo'd row tiles ----
    # TODO(synk): if the surrounding model keeps activations in NHWC the two transposes
    # disappear, and the halo-tile gather (a ~(TH+2p)/TH extra copy of the input) can be
    # replaced by an in-kernel manual DMA of the halo window straight from HBM.
    x = jnp.transpose(x_nchw, (0, 2, 3, 1))                          # NHWC
    x = jnp.pad(x, ((0, 0), (pad, pad), (pad, pad), (0, 0)))
    x_tiles = jnp.stack([x[:, r * TH: r * TH + THp] for r in range(nR)], axis=1)
    # x_tiles: (N, nR, THp, Wp, Cin)

    w = jnp.transpose(weight_oihw, (2, 3, 1, 0))                     # HWIO (K, K, Cin, Cout)
    w = jnp.pad(w, ((0, 0), (0, 0), (0, 0), (0, Cout_p - Cout)))
    w = w.reshape(K * K, Cin, Cout_p).astype(jnp.float32)            # taps on leading axis
    b = jnp.pad(bias, (0, Cout_p - Cout)).reshape(1, Cout_p).astype(jnp.float32)

    kernel = functools.partial(_conv_block_kernel, TH=TH, W=W, K=K, scale=scale)

    flops = 2 * N * H * W * Cin * Cout_p * K * K
    bytes_accessed = x_tiles.size * 4 + w.size * 4 + N * H * W * Cout_p * 4

    out_p = pl.pallas_call(
        kernel,
        out_shape=jax.ShapeDtypeStruct((N, H, W, Cout_p), x.dtype),
        grid_spec=pltpu.PrefetchScalarGridSpec(
            num_scalar_prefetch=0,
            grid=(N, nR),                                            # batch x row-tiles
            in_specs=[
                pl.BlockSpec((None, None, THp, Wp, Cin), lambda n, r: (n, r, 0, 0, 0)),
                pl.BlockSpec((K * K, Cin, Cout_p), lambda n, r: (0, 0, 0)),   # resident
                pl.BlockSpec((1, Cout_p), lambda n, r: (0, 0)),               # resident
            ],
            out_specs=pl.BlockSpec((None, TH, W, Cout_p), lambda n, r: (n, r, 0, 0)),
            scratch_shapes=[pltpu.VMEM((TH * W, Cout_p), jnp.float32)],
        ),
        compiler_params=pltpu.CompilerParams(
            dimension_semantics=("parallel", "parallel"),
            vmem_limit_bytes=48 * 1024 * 1024,     # sized against v7x's 64 MiB VMEM
        ),
        cost_estimate=pl.CostEstimate(
            flops=flops, transcendentals=0, bytes_accessed=bytes_accessed),
    )(x_tiles, w, b)

    out = out_p[..., :Cout]                                          # drop lane padding
    return jnp.transpose(out, (0, 3, 1, 2))                          # back to NCHW


def conv_block_reference(x, weight, bias, *, wscale_gain=math.sqrt(2.0)):
    """Pure-JAX reference matching the PyTorch ConvBlock (default config), in full f32."""
    N, Cin, H, W = x.shape
    Cout, _, K, _ = weight.shape
    scale = wscale_gain / math.sqrt(Cin * K * K)
    pad = (K - 1) // 2
    y = jax.lax.conv_general_dilated(
        x, weight, window_strides=(1, 1), padding=[(pad, pad), (pad, pad)],
        dimension_numbers=("NCHW", "OIHW", "NCHW"),
        precision=jax.lax.Precision.HIGHEST)
    y = y * scale + bias.reshape(1, Cout, 1, 1)
    return jnp.where(y >= 0, y, 0.2 * y)


if __name__ == "__main__":
    N, Cin, Cout, H, W, K = 2, 4, 8, 16, 16, 3
    key = jax.random.PRNGKey(0)
    k_x, k_w = jax.random.split(key)

    # Deterministic synthetic parameters (nn.Conv2d weight shape: OIHW;
    # WScaleLayer bias initialized to zeros, as in the module).
    x = jax.random.normal(k_x, (N, Cin, H, W), jnp.float32)
    weight = jax.random.normal(k_w, (Cout, Cin, K, K), jnp.float32)
    bias = jnp.zeros((Cout,), jnp.float32)

    out = jax.block_until_ready(conv_block_forward(x, weight, bias))
    ref = conv_block_reference(x, weight, bias)

    assert out.shape == (N, Cout, H, W), out.shape
    # The kernel runs the MXU at default (single-pass) precision per the perf guidance;
    # compare against an f32 (HIGHEST) reference with a matching small tolerance.
    max_err = float(jnp.max(jnp.abs(out - ref)))
    assert jnp.allclose(out, ref, rtol=2e-2, atol=2e-2), max_err
    print("KERNEL_OK")
</pallas_src>

<mosaic_0001>
module attributes {stable_mosaic.version = 11 : i64} {
  func.func @_conv_block_kernel(%arg0: i32, %arg1: i32, %arg2: memref<1x1x10x18x4xf32, #tpu.memory_space<vmem>>, %arg3: memref<9x4x128xf32, #tpu.memory_space<vmem>>, %arg4: memref<1x128xf32, #tpu.memory_space<vmem>>, %arg5: memref<1x8x16x128xf32, #tpu.memory_space<vmem>>, %arg6: memref<128x128xf32, #tpu.memory_space<vmem>>) attributes {dimension_semantics = [#tpu.dimension_semantics<parallel>, #tpu.dimension_semantics<parallel>], iteration_bounds = array<i64: 2, 2>, scalar_prefetch = 0 : i64, scratch_operands = 1 : i64, tpu.core_type = #tpu.core_type<tc>, window_params = [{transform_indices = @transform_0, window_bounds = array<i64: 1, 1, 10, 18, 4>}, {pipeline_mode = #tpu.pipeline_mode<synchronous>, transform_indices = @transform_1, window_bounds = array<i64: 9, 4, 128>}, {pipeline_mode = #tpu.pipeline_mode<synchronous>, transform_indices = @transform_2, window_bounds = array<i64: 1, 128>}, {transform_indices = @transform_3, window_bounds = array<i64: 1, 8, 16, 128>}]} {
    %c0 = arith.constant 0 : index
    %c0_0 = arith.constant 0 : index
    %c0_1 = arith.constant 0 : index
    %c0_2 = arith.constant 0 : index
    %c0_3 = arith.constant 0 : index
    %0 = vector.load %arg2[%c0, %c0_0, %c0_1, %c0_2, %c0_3] : memref<1x1x10x18x4xf32, #tpu.memory_space<vmem>>, vector<1x1x10x18x4xf32>
    %1 = vector.shape_cast %0 : vector<1x1x10x18x4xf32> to vector<10x18x4xf32>
    %cst = arith.constant 0.000000e+00 : f32
    %2 = vector.broadcast %cst : f32 to vector<128x128xf32>
    %c0_4 = arith.constant 0 : index
    %c0_5 = arith.constant 0 : index
    %3 = vector.load %arg6[%c0_4, %c0_5] : memref<128x128xf32, #tpu.memory_space<vmem>>, vector<128x128xf32>
    tpu.vector_store %arg6[%c0_4, %c0_5], %2 {strides = array<i32>} : memref<128x128xf32, #tpu.memory_space<vmem>>, vector<128x128xf32>,
    %4 = vector.extract_strided_slice %1 {offsets = [0, 0, 0], sizes = [8, 16, 4], strides = [1, 1, 1]} : vector<10x18x4xf32> to vector<8x16x4xf32>
    %5 = vector.shape_cast %4 : vector<8x16x4xf32> to vector<128x4xf32>
    %c0_6 = arith.constant 0 : index
    %c0_7 = arith.constant 0 : index
    %6 = vector.load %arg6[%c0_6, %c0_7] : memref<128x128xf32, #tpu.memory_space<vmem>>, vector<128x128xf32>
    %c0_8 = arith.constant 0 : index
    %c0_9 = arith.constant 0 : index
    %c0_10 = arith.constant 0 : index
    %7 = vector.load %arg3[%c0_8, %c0_9, %c0_10] : memref<9x4x128xf32, #tpu.memory_space<vmem>>, vector<1x4x128xf32>
    %8 = vector.shape_cast %7 : vector<1x4x128xf32> to vector<4x128xf32>
    %cst_11 = arith.constant dense<0.000000e+00> : vector<128x128xf32>
    %9 = tpu.matmul %5, %8, %cst_11 {dimension_numbers = #tpu.dot_dimension_numbers<[1], [0], [0], [1], [0, 0, 1, 1], [], []>} : vector<128x4xf32>, vector<4x128xf32>, vector<128x128xf32> -> vector<128x128xf32>
    %10 = arith.addf %6, %9 : vector<128x128xf32>
    %c0_12 = arith.constant 0 : index
    %c0_13 = arith.constant 0 : index
    %11 = vector.load %arg6[%c0_12, %c0_13] : memref<128x128xf32, #tpu.memory_space<vmem>>, vector<128x128xf32>
    tpu.vector_store %arg6[%c0_12, %c0_13], %10 {strides = array<i32>} : memref<128x128xf32, #tpu.memory_space<vmem>>, vector<128x128xf32>,
    %12 = vector.extract_strided_slice %1 {offsets = [0, 1, 0], sizes = [8, 16, 4], strides = [1, 1, 1]} : vector<10x18x4xf32> to vector<8x16x4xf32>
    %13 = vector.shape_cast %12 : vector<8x16x4xf32> to vector<128x4xf32>
    %c0_14 = arith.constant 0 : index
    %c0_15 = arith.constant 0 : index
    %14 = vector.load %arg6[%c0_14, %c0_15] : memref<128x128xf32, #tpu.memory_space<vmem>>, vector<128x128xf32>
    %c1 = arith.constant 1 : index
    %c0_16 = arith.constant 0 : index
    %c0_17 = arith.constant 0 : index
    %15 = vector.load %arg3[%c1, %c0_16, %c0_17] : memref<9x4x128xf32, #tpu.memory_space<vmem>>, vector<1x4x128xf32>
    %16 = vector.shape_cast %15 : vector<1x4x128xf32> to vector<4x128xf32>
    %cst_18 = arith.constant dense<0.000000e+00> : vector<128x128xf32>
    %17 = tpu.matmul %13, %16, %cst_18 {dimension_numbers = #tpu.dot_dimension_numbers<[1], [0], [0], [1], [0, 0, 1, 1], [], []>} : vector<128x4xf32>, vector<4x128xf32>, vector<128x128xf32> -> vector<128x128xf32>
    %18 = arith.addf %14, %17 : vector<128x128xf32>
    %c0_19 = arith.constant 0 : index
    %c0_20 = arith.constant 0 : index
    %19 = vector.load %arg6[%c0_19, %c0_20] : memref<128x128xf32, #tpu.memory_space<vmem>>, vector<128x128xf32>
    tpu.vector_store %arg6[%c0_19, %c0_20], %18 {strides = array<i32>} : memref<128x128xf32, #tpu.memory_space<vmem>>, vector<128x128xf32>,
    %20 = vector.extract_strided_slice %1 {offsets = [0, 2, 0], sizes = [8, 16, 4], strides = [1, 1, 1]} : vector<10x18x4xf32> to vector<8x16x4xf32>
    %21 = vector.shape_cast %20 : vector<8x16x4xf32> to vector<128x4xf32>
    %c0_21 = arith.constant 0 : index
    %c0_22 = arith.constant 0 : index
    %22 = vector.load %arg6[%c0_21, %c0_22] : memref<128x128xf32, #tpu.memory_space<vmem>>, vector<128x128xf32>
    %c2 = arith.constant 2 : index
    %c0_23 = arith.constant 0 : index
    %c0_24 = arith.constant 0 : index
    %23 = vector.load %arg3[%c2, %c0_23, %c0_24] : memref<9x4x128xf32, #tpu.memory_space<vmem>>, vector<1x4x128xf32>
    %24 = vector.shape_cast %23 : vector<1x4x128xf32> to vector<4x128xf32>
    %cst_25 = arith.constant dense<0.000000e+00> : vector<128x128xf32>
    %25 = tpu.matmul %21, %24, %cst_25 {dimension_numbers = #tpu.dot_dimension_numbers<[1], [0], [0], [1], [0, 0, 1, 1], [], []>} : vector<128x4xf32>, vector<4x128xf32>, vector<128x128xf32> -> vector<128x128xf32>
    %26 = arith.addf %22, %25 : vector<128x128xf32>
    %c0_26 = arith.constant 0 : index
    %c0_27 = arith.constant 0 : index
    %27 = vector.load %arg6[%c0_26, %c0_27] : memref<128x128xf32, #tpu.memory_space<vmem>>, vector<128x128xf32>
    tpu.vector_store %arg6[%c0_26, %c0_27], %26 {strides = array<i32>} : memref<128x128xf32, #tpu.memory_space<vmem>>, vector<128x128xf32>,
    %28 = vector.extract_strided_slice %1 {offsets = [1, 0, 0], sizes = [8, 16, 4], strides = [1, 1, 1]} : vector<10x18x4xf32> to vector<8x16x4xf32>
    %29 = vector.shape_cast %28 : vector<8x16x4xf32> to vector<128x4xf32>
    %c0_28 = arith.constant 0 : index
    %c0_29 = arith.constant 0 : index
    %30 = vector.load %arg6[%c0_28, %c0_29] : memref<128x128xf32, #tpu.memory_space<vmem>>, vector<128x128xf32>
    %c3 = arith.constant 3 : index
    %c0_30 = arith.constant 0 : index
    %c0_31 = arith.constant 0 : index
    %31 = vector.load %arg3[%c3, %c0_30, %c0_31] : memref<9x4x128xf32, #tpu.memory_space<vmem>>, vector<1x4x128xf32>
    %32 = vector.shape_cast %31 : vector<1x4x128xf32> to vector<4x128xf32>
    %cst_32 = arith.constant dense<0.000000e+00> : vector<128x128xf32>
    %33 = tpu.matmul %29, %32, %cst_32 {dimension_numbers = #tpu.dot_dimension_numbers<[1], [0], [0], [1], [0, 0, 1, 1], [], []>} : vector<128x4xf32>, vector<4x128xf32>, vector<128x128xf32> -> vector<128x128xf32>
    %34 = arith.addf %30, %33 : vector<128x128xf32>
    %c0_33 = arith.constant 0 : index
    %c0_34 = arith.constant 0 : index
    %35 = vector.load %arg6[%c0_33, %c0_34] : memref<128x128xf32, #tpu.memory_space<vmem>>, vector<128x128xf32>
    tpu.vector_store %arg6[%c0_33, %c0_34], %34 {strides = array<i32>} : memref<128x128xf32, #tpu.memory_space<vmem>>, vector<128x128xf32>,
    %36 = vector.extract_strided_slice %1 {offsets = [1, 1, 0], sizes = [8, 16, 4], strides = [1, 1, 1]} : vector<10x18x4xf32> to vector<8x16x4xf32>
    %37 = vector.shape_cast %36 : vector<8x16x4xf32> to vector<128x4xf32>
    %c0_35 = arith.constant 0 : index
    %c0_36 = arith.constant 0 : index
    %38 = vector.load %arg6[%c0_35, %c0_36] : memref<128x128xf32, #tpu.memory_space<vmem>>, vector<128x128xf32>
    %c4 = arith.constant 4 : index
    %c0_37 = arith.constant 0 : index
    %c0_38 = arith.constant 0 : index
    %39 = vector.load %arg3[%c4, %c0_37, %c0_38] : memref<9x4x128xf32, #tpu.memory_space<vmem>>, vector<1x4x128xf32>
    %40 = vector.shape_cast %39 : vector<1x4x128xf32> to vector<4x128xf32>
    %cst_39 = arith.constant dense<0.000000e+00> : vector<128x128xf32>
    %41 = tpu.matmul %37, %40, %cst_39 {dimension_numbers = #tpu.dot_dimension_numbers<[1], [0], [0], [1], [0, 0, 1, 1], [], []>} : vector<128x4xf32>, vector<4x128xf32>, vector<128x128xf32> -> vector<128x128xf32>
    %42 = arith.addf %38, %41 : vector<128x128xf32>
    %c0_40 = arith.constant 0 : index
    %c0_41 = arith.constant 0 : index
    %43 = vector.load %arg6[%c0_40, %c0_41] : memref<128x128xf32, #tpu.memory_space<vmem>>, vector<128x128xf32>
    tpu.vector_store %arg6[%c0_40, %c0_41], %42 {strides = array<i32>} : memref<128x128xf32, #tpu.memory_space<vmem>>, vector<128x128xf32>,
    %44 = vector.extract_strided_slice %1 {offsets = [1, 2, 0], sizes = [8, 16, 4], strides = [1, 1, 1]} : vector<10x18x4xf32> to vector<8x16x4xf32>
    %45 = vector.shape_cast %44 : vector<8x16x4xf32> to vector<128x4xf32>
    %c0_42 = arith.constant 0 : index
    %c0_43 = arith.constant 0 : index
    %46 = vector.load %arg6[%c0_42, %c0_43] : memref<128x128xf32, #tpu.memory_space<vmem>>, vector<128x128xf32>
    %c5 = arith.constant 5 : index
    %c0_44 = arith.constant 0 : index
    %c0_45 = arith.constant 0 : index
    %47 = vector.load %arg3[%c5, %c0_44, %c0_45] : memref<9x4x128xf32, #tpu.memory_space<vmem>>, vector<1x4x128xf32>
    %48 = vector.shape_cast %47 : vector<1x4x128xf32> to vector<4x128xf32>
    %cst_46 = arith.constant dense<0.000000e+00> : vector<128x128xf32>
    %49 = tpu.matmul %45, %48, %cst_46 {dimension_numbers = #tpu.dot_dimension_numbers<[1], [0], [0], [1], [0, 0, 1, 1], [], []>} : vector<128x4xf32>, vector<4x128xf32>, vector<128x128xf32> -> vector<128x128xf32>
    %50 = arith.addf %46, %49 : vector<128x128xf32>
    %c0_47 = arith.constant 0 : index
    %c0_48 = arith.constant 0 : index
    %51 = vector.load %arg6[%c0_47, %c0_48] : memref<128x128xf32, #tpu.memory_space<vmem>>, vector<128x128xf32>
    tpu.vector_store %arg6[%c0_47, %c0_48], %50 {strides = array<i32>} : memref<128x128xf32, #tpu.memory_space<vmem>>, vector<128x128xf32>,
    %52 = vector.extract_strided_slice %1 {offsets = [2, 0, 0], sizes = [8, 16, 4], strides = [1, 1, 1]} : vector<10x18x4xf32> to vector<8x16x4xf32>
    %53 = vector.shape_cast %52 : vector<8x16x4xf32> to vector<128x4xf32>
    %c0_49 = arith.constant 0 : index
    %c0_50 = arith.constant 0 : index
    %54 = vector.load %arg6[%c0_49, %c0_50] : memref<128x128xf32, #tpu.memory_space<vmem>>, vector<128x128xf32>
    %c6 = arith.constant 6 : index
    %c0_51 = arith.constant 0 : index
    %c0_52 = arith.constant 0 : index
    %55 = vector.load %arg3[%c6, %c0_51, %c0_52] : memref<9x4x128xf32, #tpu.memory_space<vmem>>, vector<1x4x128xf32>
    %56 = vector.shape_cast %55 : vector<1x4x128xf32> to vector<4x128xf32>
    %cst_53 = arith.constant dense<0.000000e+00> : vector<128x128xf32>
    %57 = tpu.matmul %53, %56, %cst_53 {dimension_numbers = #tpu.dot_dimension_numbers<[1], [0], [0], [1], [0, 0, 1, 1], [], []>} : vector<128x4xf32>, vector<4x128xf32>, vector<128x128xf32> -> vector<128x128xf32>
    %58 = arith.addf %54, %57 : vector<128x128xf32>
    %c0_54 = arith.constant 0 : index
    %c0_55 = arith.constant 0 : index
    %59 = vector.load %arg6[%c0_54, %c0_55] : memref<128x128xf32, #tpu.memory_space<vmem>>, vector<128x128xf32>
    tpu.vector_store %arg6[%c0_54, %c0_55], %58 {strides = array<i32>} : memref<128x128xf32, #tpu.memory_space<vmem>>, vector<128x128xf32>,
    %60 = vector.extract_strided_slice %1 {offsets = [2, 1, 0], sizes = [8, 16, 4], strides = [1, 1, 1]} : vector<10x18x4xf32> to vector<8x16x4xf32>
    %61 = vector.shape_cast %60 : vector<8x16x4xf32> to vector<128x4xf32>
    %c0_56 = arith.constant 0 : index
    %c0_57 = arith.constant 0 : index
    %62 = vector.load %arg6[%c0_56, %c0_57] : memref<128x128xf32, #tpu.memory_space<vmem>>, vector<128x128xf32>
    %c7 = arith.constant 7 : index
    %c0_58 = arith.constant 0 : index
    %c0_59 = arith.constant 0 : index
    %63 = vector.load %arg3[%c7, %c0_58, %c0_59] : memref<9x4x128xf32, #tpu.memory_space<vmem>>, vector<1x4x128xf32>
    %64 = vector.shape_cast %63 : vector<1x4x128xf32> to vector<4x128xf32>
    %cst_60 = arith.constant dense<0.000000e+00> : vector<128x128xf32>
    %65 = tpu.matmul %61, %64, %cst_60 {dimension_numbers = #tpu.dot_dimension_numbers<[1], [0], [0], [1], [0, 0, 1, 1], [], []>} : vector<128x4xf32>, vector<4x128xf32>, vector<128x128xf32> -> vector<128x128xf32>
    %66 = arith.addf %62, %65 : vector<128x128xf32>
    %c0_61 = arith.constant 0 : index
    %c0_62 = arith.constant 0 : index
    %67 = vector.load %arg6[%c0_61, %c0_62] : memref<128x128xf32, #tpu.memory_space<vmem>>, vector<128x128xf32>
    tpu.vector_store %arg6[%c0_61, %c0_62], %66 {strides = array<i32>} : memref<128x128xf32, #tpu.memory_space<vmem>>, vector<128x128xf32>,
    %68 = vector.extract_strided_slice %1 {offsets = [2, 2, 0], sizes = [8, 16, 4], strides = [1, 1, 1]} : vector<10x18x4xf32> to vector<8x16x4xf32>
    %69 = vector.shape_cast %68 : vector<8x16x4xf32> to vector<128x4xf32>
    %c0_63 = arith.constant 0 : index
    %c0_64 = arith.constant 0 : index
    %70 = vector.load %arg6[%c0_63, %c0_64] : memref<128x128xf32, #tpu.memory_space<vmem>>, vector<128x128xf32>
    %c8 = arith.constant 8 : index
    %c0_65 = arith.constant 0 : index
    %c0_66 = arith.constant 0 : index
    %71 = vector.load %arg3[%c8, %c0_65, %c0_66] : memref<9x4x128xf32, #tpu.memory_space<vmem>>, vector<1x4x128xf32>
    %72 = vector.shape_cast %71 : vector<1x4x128xf32> to vector<4x128xf32>
    %cst_67 = arith.constant dense<0.000000e+00> : vector<128x128xf32>
    %73 = tpu.matmul %69, %72, %cst_67 {dimension_numbers = #tpu.dot_dimension_numbers<[1], [0], [0], [1], [0, 0, 1, 1], [], []>} : vector<128x4xf32>, vector<4x128xf32>, vector<128x128xf32> -> vector<128x128xf32>
    %74 = arith.addf %70, %73 : vector<128x128xf32>
    %c0_68 = arith.constant 0 : index
    %c0_69 = arith.constant 0 : index
    %75 = vector.load %arg6[%c0_68, %c0_69] : memref<128x128xf32, #tpu.memory_space<vmem>>, vector<128x128xf32>
    tpu.vector_store %arg6[%c0_68, %c0_69], %74 {strides = array<i32>} : memref<128x128xf32, #tpu.memory_space<vmem>>, vector<128x128xf32>,
    %c0_70 = arith.constant 0 : index
    %c0_71 = arith.constant 0 : index
    %76 = vector.load %arg6[%c0_70, %c0_71] : memref<128x128xf32, #tpu.memory_space<vmem>>, vector<128x128xf32>
    %cst_72 = arith.constant 0.235702261 : f32
    %77 = vector.broadcast %cst_72 : f32 to vector<128x128xf32>
    %78 = arith.mulf %76, %77 : vector<128x128xf32>
    %c0_73 = arith.constant 0 : index
    %c0_74 = arith.constant 0 : index
    %79 = vector.load %arg4[%c0_73, %c0_74] : memref<1x128xf32, #tpu.memory_space<vmem>>, vector<1x128xf32>
    %80 = vector.broadcast %79 : vector<1x128xf32> to vector<128x128xf32>
    %81 = arith.addf %78, %80 : vector<128x128xf32>
    %cst_75 = arith.constant 0.000000e+00 : f32
    %82 = vector.broadcast %cst_75 : f32 to vector<128x128xf32>
    %83 = arith.cmpf oge, %81, %82 : vector<128x128xf32>
    %cst_76 = arith.constant 2.000000e-01 : f32
    %84 = vector.broadcast %cst_76 : f32 to vector<128x128xf32>
    %85 = arith.mulf %84, %81 : vector<128x128xf32>
    %86 = arith.select %83, %81, %85 : vector<128x128xi1>, vector<128x128xf32>
    %87 = vector.shape_cast %86 : vector<128x128xf32> to vector<8x16x128xf32>
    %c0_77 = arith.constant 0 : index
    %c0_78 = arith.constant 0 : index
    %c0_79 = arith.constant 0 : index
    %c0_80 = arith.constant 0 : index
    %88 = vector.load %arg5[%c0_77, %c0_78, %c0_79, %c0_80] : memref<1x8x16x128xf32, #tpu.memory_space<vmem>>, vector<1x8x16x128xf32>
    %89 = vector.shape_cast %88 : vector<1x8x16x128xf32> to vector<8x16x128xf32>
    %90 = vector.shape_cast %87 : vector<8x16x128xf32> to vector<1x8x16x128xf32>
    tpu.vector_store %arg5[%c0_77, %c0_78, %c0_79, %c0_80], %90 {strides = array<i32>} : memref<1x8x16x128xf32, #tpu.memory_space<vmem>>, vector<1x8x16x128xf32>,
    return
  }
  func.func @transform_0(%arg0: i32, %arg1: i32) -> (i32, i32, i32, i32, i32) {
    %c0_i32 = arith.constant 0 : i32
    %c0_i32_0 = arith.constant 0 : i32
    %c0_i32_1 = arith.constant 0 : i32
    %c0_i32_2 = arith.constant 0 : i32
    return %arg0, %arg1, %c0_i32, %c0_i32_0, %c0_i32_1 : i32, i32, i32, i32, i32
  }
  func.func @transform_1(%arg0: i32, %arg1: i32) -> (i32, i32, i32) {
    %c0_i32 = arith.constant 0 : i32
    %c0_i32_0 = arith.constant 0 : i32
    %c0_i32_1 = arith.constant 0 : i32
    %c0_i32_2 = arith.constant 0 : i32
    return %c0_i32, %c0_i32_0, %c0_i32_1 : i32, i32, i32
  }
  func.func @transform_2(%arg0: i32, %arg1: i32) -> (i32, i32) {
    %c0_i32 = arith.constant 0 : i32
    %c0_i32_0 = arith.constant 0 : i32
    %c0_i32_1 = arith.constant 0 : i32
    return %c0_i32, %c0_i32_0 : i32, i32
  }
  func.func @transform_3(%arg0: i32, %arg1: i32) -> (i32, i32, i32, i32) {
    %c0_i32 = arith.constant 0 : i32
    %c0_i32_0 = arith.constant 0 : i32
    %c0_i32_1 = arith.constant 0 : i32
    return %arg0, %arg1, %c0_i32, %c0_i32_0 : i32, i32, i32, i32
  }
}

</mosaic_0001>

<bundles_post_ra>
// kernel: tpu_custom_call.1
= control target key start
LH: loop header
LB: loop body
LE: loop exit
PB: predicated region body
PF: predicated region fallthrough
CT: control target
= control target key end

     0   :  { %8 = vsyncpa [#allocation4], 0  ;;  %s4157_s0 = inlined_call_operand.vmem [shape: f32[2,2,10,18,4], index: 0, kind: input, shape index: {}]   ;;  %s4158_s1 = inlined_call_operand.vmem [shape: f32[9,4,128], index: 1, kind: input, shape index: {}]   ;;  %s4159_s2 = inlined_call_operand.vmem [shape: f32[1,128], index: 2, kind: input, shape index: {}]   ;;  %s4160_s3 = inlined_call_operand.hbm [shape: f32[2,16,16,128], index: 3, kind: output, shape index: {}]  }
   0x1   :  { %10 = vsyncpa [#allocation4 + $0x1], 0  ;;  %s3388_s12 = smov 0   ;;  %s3390_s13 = smov 0  }
   0x2   :  { %s3392_s14 = smov 0   ;;  %s3394_s15 = smov 0  }
   0x3   :  { %s3396_s16 = smov 0   ;;  %s3398_s17 = smov 0  }
   0x4   :  { %s3400_s18 = smov 0   ;;  %s3402_s19 = smov 0  }
   0x5 LB: > { %s2500_s20 = sadd.s32 4294967295, %s3363_s19   ;;  %s2501_s21 = sadd.s32 4294967294, %s3363_s19   ;;  %s3363_s19 = sphi %s3402_s19, %s16_s19   ;;  %s3359_s18 = sphi %s3400_s18, %s4171_s18   ;;  %s3355_s17 = sphi %s3398_s17, %s4170_s17   ;;  %s3351_s16 = sphi %s3396_s16, %s4169_s16   ;;  %s3347_s15 = sphi %s3394_s15, %s4168_s15   ;;  %s3343_s14 = sphi %s3392_s14, %s4167_s14   ;;  %s3339_s13 = sphi %s3390_s13, %s4166_s13   ;;  %s3335_s12 = sphi %s3388_s12, %s4165_s12  }
   0x6   : > { %s25_s22 = sadd.s32 1, %s3355_s17  ;;  %s28_s23 = sadd.s32 1, %s3359_s18 }
   0x7   : > { %p26_p0 = scmp.ge.s32.totalorder %s25_s22, 2  ;;  %p117_p1 = scmp.ne.s32.totalorder %s3343_s14, %s3339_s13 }
   0x8   : > { %p118_p2 = scmp.eq.s32.totalorder %s2500_s20, 3  ;;  %p123_p5 = scmp.ne.s32.totalorder %s3339_s13, %s3335_s12 }
   0x9   : > { %s4173_s22 = smov (%p26_p0, %s25_s22), 0  ;;  %s4175_s23 = smov (!%p26_p0, %s28_s23), %s3359_s18 }
   0xa   : > { %s103_s24 = ssub.s32 %s3355_s17, %s4173_s22  ;;  %p3439_p3 = por %p118_p2, %p117_p1 }
   0xb   : > { %p30_p4 = scmp.ge.s32.totalorder %s4175_s23, 2  ;;  %p124_p6 = scmp.eq.s32.totalorder %s2501_s21, 3 }
   0xc   : > { %p2504_p7 = scmp.ge.s32.totalorder %s3363_s19, 1  ;;  %p160_p9 = scmp.lt.s32.totalorder %s3363_s19, 5 }
   0xd   : > { %s4177_s23 = smov (%p30_p4, %s4175_s23), 0  ;;  %p3448_p8 = por %p124_p6, %p123_p5 }
   0xe   : > { %s102_s27 = ssub.s32 %s3359_s18, %s4177_s23  ;;  %s107_s28 = sadd.s32 1, %s3343_s14 }
   0xf   : > { %s104_s29 = sor.u32 %s103_s24, %s102_s27  ;;  %p161_p10 = pnand %p2504_p7, %p160_p9 }
  0x10   : > { %p105_p11 = scmp.eq.s32.totalorder %s104_s29, 0 }
  0x11   : > { %164 = sbr.rel (%p161_p10) target bundleno = 417 (0x1a1), region = 32 }
  0x12   : > { %s3457_s30 = scalar_select %p105_p11, %s3343_s14, %s107_s28  }
  0x18   : > { %v260_v0 = vld [vmem:[%s4158_s1] sm:$0xf]  ;;  %vm310_vm0 = vcmask 1043456   ;;  %p188_p12 = scmp.lt.s32.totalorder %s3351_s16, 1  ;;  %p190_p13 = scmp.lt.s32.totalorder %s3347_s15, 1  ;;  %vm261_vm1 = vcmask 31744  }
  0x19   : > { %2830 = vmatprep.subr.msk.mxu1 %vm310_vm0, %v260_v0  ;;  %v3468_v1 = vld [vmem:[%s4158_s1 + $0x10] sm:$0xf]  ;;  %v2524_v2 = vld [vmem:[%s4158_s1 + $0x4] sm:$0xf]  ;;  %v2596_v3 = vld [vmem:[%s4158_s1 + $0x14] sm:$0xf] }
  0x1a   : > { %2831 = vmatpush3.msk.msra.mxu1 %vm310_vm0, %v260_v0  ;;  %s189_s10 = scalar_select %p188_p12, %s3351_s16, 1  ;;  %2934 = vmatprep.subr.msk.mxu0 %vm310_vm0, %v3468_v1  ;;  %vm499_vm2 = vcmask 1046528   ;;  %v3510_v9 = vld [vmem:[%s4158_s1 + $0x8] sm:$0xf]  ;;  %v2614_v29 = vld [vmem:[%s4158_s1 + $0x18] sm:$0xf] }
  0x1b   : > { %s191_s21 = scalar_select %p190_p13, %s3347_s15, 1  ;;  %2935 = vmatpush3.msk.msra.mxu0 %vm310_vm0, %v3468_v1  ;;  %2856 = vmatprep.subr.msk.mxu1 %vm310_vm0, %v2524_v2  ;;  %vm770_vm3 = vcmask 1045504   ;;  %v3643_v53 = vld [vmem:[%s4158_s1 + $0x1c] sm:$0xf] }
  0x1c   : > { %s3195_s24 = smul.u32 60, %s189_s10  ;;  %2960 = vmatprep.subr.msk.mxu0 %vm310_vm0, %v2596_v3  ;;  %s2676_s8 = sshll.u32 %s3347_s15, 4 }
  0x1d   : > { %s3194_s27 = smul.u32 30, %s191_s21  ;;  %s2672_s9 = sshll.u32 %s3351_s16, 5 }
  0x1e   : > { %s2412_s15 = sadd.s32 %s2676_s8, %s2672_s9 }
  0x1f   : > { %s194_s28 = sadd.s32 %s3195_s24, %s3194_s27  ;;  %s2673_s16 = sshll.u32 %s2412_s15, 7 }
  0x20   : > { %s2506_s29 = sshll.u32 %s194_s28, 3  ;;  %s4097_s21 = scalar_lea.hbm %s4160_s3, %s2673_s16 }
  0x21   : > { %s3488_s6 = scalar_lea.vmem %s4157_s0, %s2506_s29  ;;  %s185_s29 = sand.u32 1, %s3339_s13  }
  0x22   : > { %v3491_v4 = vld [vmem:[%s3488_s6] sm:$0xff]  ;;  %v3494_v5 = vld [vmem:[%s3488_s6 + $0x8] sm:$0xff]  ;;  %v3497_v6 = vld [vmem:[%s3488_s6 + $0x18] sm:$0xff]  ;;  %s4105_s24 = scalar_lea.sflag [#allocation4], %s185_s29  ;;  %s3365_s28 = smov [#allocation3]  }
  0x23   : > { %2832 = vmatprep.mubr.msk.f32.mxu1 %vm261_vm1, %v3491_v4  ;;  %v3502_v7 = vld [vmem:[%s3488_s6 + $0x20] sm:$0xff]  ;;  %v3505_v8 = vld [vmem:[%s3488_s6 + $0x30] sm:$0xff]  ;;  %v505_v10 = vrot.slane %v3497_v6, 1  ;;  %v203_v12 = vld [vmem:[%s3488_s6 + $0x28] sm:$0x3]  ;;  %v776_v39 = vrot.slane %v3497_v6, 2 }
  0x24   : > { %2833 = vmatmul.mubr.msk.f32.vlgmr.msra.gmra.mrb[0].mxu1 %vm261_vm1, %v3494_v5  ;;  %v506_v11 = vrot.slane %v3502_v7, 1  ;;  %v3518_v13 = vld [vmem:[%s3488_s6 + $0x38] sm:$0xff]  ;;  %v510_v14 = vrot.slane %v3505_v8, 1  ;;  %v508_v15 = vrot.slane %v203_v12, 1  ;;  %v3526_v17 = vld [vmem:[%s3488_s6 + $0x40] sm:$0x3] }
  0x25   : > { %2835 = vmatprep.mubr.msk.f32.mxu1 %vm261_vm1, %v3497_v6  ;;  %2857 = vmatpush3.msk.msra.mxu1 %vm310_vm0, %v2524_v2  ;;  %v511_v16 = vrot.slane %v3518_v13, 1  ;;  %v3529_v18 = vld [vmem:[%s3488_s6 + $0x48] sm:$0xff]  ;;  %v513_v20 = vrot.slane %v3526_v17, 1  ;;  %v3536_v21 = vld [vmem:[%s3488_s6 + $0x50] sm:$0xff]  ;;  %v3540_v23 = vld [vmem:[%s3488_s6 + $0x58] sm:$0x3] }
  0x26   : > { %v3532_v19 = vsel %vm499_vm2, %v505_v10, %v506_v11  ;;  %v515_v22 = vrot.slane %v3529_v18, 1  ;;  %2882 = vmatprep.subr.msk.mxu1 %vm310_vm0, %v3510_v9  ;;  %v3547_v24 = vsel %vm499_vm2, %v506_v11, %v508_v15  ;;  %v516_v26 = vrot.slane %v3536_v21, 1  ;;  %v3554_v27 = vld [vmem:[%s3488_s6 + $0x60] sm:$0xff]  ;;  %v3557_v28 = vld [vmem:[%s3488_s6 + $0x68] sm:$0xff]  ;;  %v3581_v35 = vld [vmem:[%s3488_s6 + $0x70] sm:$0x3] }
  0x27   : > { %2936 = vmatprep.mubr.msk.f32.mxu0 %vm261_vm1, %v3532_v19  ;;  %v3550_v25 = vsel %vm499_vm2, %v510_v14, %v511_v16  ;;  %v3570_v30 = vsel %vm499_vm2, %v511_v16, %v513_v20  ;;  %v518_v31 = vrot.slane %v3540_v23, 1  ;;  %v520_v33 = vrot.slane %v3554_v27, 1  ;;  %v3616_v44 = vld [vmem:[%s3488_s6 + $0x78] sm:$0xff]  ;;  %v3632_v48 = vld [vmem:[%s3488_s6 + $0x80] sm:$0xff]  ;;  %v3650_v56 = vld [vmem:[%s3488_s6 + $0x90] sm:$0xff]  ;;  %s3273_s4 = sshll.u32 %s3365_s28, 4  ;;  %s3274_s4 = int_to_ptr.vmem [resolvable:$false] %s3273_s4 }
  0x28   : > { %2937 = vmatmul.mubr.msk.f32.vlgmr.msra.gmra.mrb[0].mxu0 %vm261_vm1, %v3547_v24  ;;  %2836 = vmatmul.mubr.msk.f32.gmra.mrb[2].mxu1 %vm261_vm1, %v3502_v7  ;;  %v3576_v32 = vsel %vm499_vm2, %v515_v22, %v516_v26  ;;  %v521_v34 = vrot.slane %v3557_v28, 1  ;;  %v523_v37 = vrot.slane %v3581_v35, 1  ;;  %v777_v40 = vrot.slane %v3502_v7, 2  ;;  %v3646_v54 = vld [vmem:[%s3488_s6 + $0xd8] sm:$0xff]  ;;  %v3654_v58 = vld [vmem:[%s3488_s6 + $0xe0] sm:$0xff]  ;;  %v3683_v14 = vld [vmem:[%s3488_s6 + $0xa8] sm:$0xff] }
  0x29   : > { %2961 = vmatpush3.msk.msra.mxu0 %vm310_vm0, %v2596_v3  ;;  %2939 = vmatprep.mubr.msk.f32.mxu0 %vm261_vm1, %v3550_v25  ;;  %v3593_v36 = vsel %vm499_vm2, %v516_v26, %v518_v31  ;;  %v779_v41 = vrot.slane %v203_v12, 2  ;;  %v781_v45 = vrot.slane %v3505_v8, 2  ;;  %v782_v46 = vrot.slane %v3518_v13, 2  ;;  %v227_v59 = vld [vmem:[%s3488_s6 + $0xe8] sm:$0x3]  ;;  %v3672_v2 = vld [vmem:[%s3488_s6 + $0x98] sm:$0xff] }
  0x2a   : > { %2838 = vmatprep.mubr.msk.f32.mxu1 %vm261_vm1, %v3505_v8  ;;  %2986 = vmatprep.subr.msk.mxu0 %vm310_vm0, %v2614_v29  ;;  %v3597_v38 = vsel %vm499_vm2, %v520_v33, %v521_v34  ;;  %v3610_v42 = vsel %vm499_vm2, %v521_v34, %v523_v37  ;;  %v3613_v43 = vsel %vm770_vm3, %v776_v39, %v777_v40  ;;  %v784_v49 = vrot.slane %v3526_v17, 2  ;;  %v3686_v15 = vld [vmem:[%s3488_s6 + $0x10] sm:$0x3]  ;;  %s3275_s5 = scalar_lea.vmem %s3274_s4, 4096 }
  0x2b   : > { %v3629_v47 = vsel %vm770_vm3, %v777_v40, %v779_v41  ;;  %v3636_v50 = vsel %vm770_vm3, %v781_v45, %v782_v46  ;;  %v786_v51 = vrot.slane %v3529_v18, 2  ;;  %v787_v52 = vrot.slane %v3536_v21, 2  ;;  %v3714_v31 = vld [vmem:[%s3488_s6 + $0xb0] sm:$0xff]  ;;  %v215_v45 = vld [vmem:[%s3488_s6 + $0x88] sm:$0x3] }
  0x2c   : > { %2940 = vmatmul.mubr.msk.f32.gmra.mrb[2].mxu0 %vm261_vm1, %v3570_v30  ;;  %2839 = vmatmul.mubr.msk.f32.gmra.mrb[4].mxu1 %vm261_vm1, %v3518_v13  ;;  %v500_v55 = vrot.slane %v3491_v4, 1  ;;  %v1865_v57 = vrot.slane %v3646_v54, 1  ;;  %v501_v60 = vrot.slane %v3494_v5, 1  ;;  %v789_v61 = vrot.slane %v3540_v23, 2 }
  0x2d   : > { %2942 = vmatprep.mubr.msk.f32.mxu0 %vm261_vm1, %v3576_v32  ;;  %2841 = vmatprep.mubr.msk.f32.mxu1 %vm261_vm1, %v3529_v18  ;;  %v2072_v62 = vrot.slane %v3646_v54, 2  ;;  %v1866_v63 = vrot.slane %v3654_v58, 1  ;;  %v3669_v0 = vsel %vm770_vm3, %v782_v46, %v784_v49  ;;  %v791_v3 = vrot.slane %v3554_v27, 2 }
  0x2e   : > { %v792_v10 = vrot.slane %v3557_v28, 2  ;;  %v2073_v11 = vrot.slane %v3654_v58, 2  ;;  %v3680_v12 = vsel %vm770_vm3, %v786_v51, %v787_v52  ;;  %v1868_v17 = vrot.slane %v227_v59, 1 }
  0x2f   : > { %v3691_v16 = vsel %vm499_vm2, %v1865_v57, %v1866_v63  ;;  %v2075_v20 = vrot.slane %v227_v59, 2  ;;  %v794_v33 = vrot.slane %v3581_v35, 2  ;;  %v503_v34 = vrot.slane %v3686_v15, 1  ;;  %v218_v57 = vld [vmem:[%s3488_s6 + $0xa0] sm:$0x3] }
  0x30   : > { %2943 = vmatmul.mubr.msk.f32.gmra.mrb[4].mxu0 %vm261_vm1, %v3593_v36  ;;  %2842 = vmatmul.mubr.msk.f32.gmra.mrb[6].mxu1 %vm261_vm1, %v3536_v21  ;;  %v3694_v22 = vsel %vm770_vm3, %v2072_v62, %v2073_v11  ;;  %v3701_v23 = vsel %vm499_vm2, %v1866_v63, %v1868_v17  ;;  %v3719_v37 = vsel %vm770_vm3, %v791_v3, %v792_v10  ;;  %v796_v40 = vrot.slane %v3616_v44, 2  ;;  %v3748_v59 = vld [vmem:[%s4158_s1 + $0xc] sm:$0xf] }
  0x31   : > { %2945 = vmatprep.mubr.msk.f32.mxu0 %vm261_vm1, %v3597_v38  ;;  %2844 = vmatprep.mubr.msk.f32.mxu1 %vm261_vm1, %v3554_v27  ;;  %v3704_v26 = vsel %vm770_vm3, %v2073_v11, %v2075_v20  ;;  %v502_v39 = vsel %vm499_vm2, %v500_v55, %v501_v60  ;;  %v797_v41 = vrot.slane %v3632_v48, 2  ;;  %v3733_v35 = vsel %vm770_vm3, %v792_v10, %v794_v33  ;;  %v221_v10 = vld [vmem:[%s3488_s6 + $0xb8] sm:$0x3]  ;;  %v3766_v11 = vld [vmem:[%s3488_s6 + $0xc0] sm:$0xff]  ;;  %v3769_v17 = vld [vmem:[%s3488_s6 + $0xc8] sm:$0xff] }
  0x32   : > { %4163 = vst [vmem:[#allocation6_spill] sm:$0xff] %v3704_v26  ;;  %v504_v46 = vsel %vm499_vm2, %v501_v60, %v503_v34  ;;  %v799_v49 = vrot.slane %v215_v45, 2  ;;  %v802_v55 = vrot.slane %v3672_v2, 2  ;;  %v806_v63 = vrot.slane %v3683_v14, 2 }
  0x33   : > { %v3737_v51 = vsel %vm770_vm3, %v796_v40, %v797_v41  ;;  %v807_v3 = vrot.slane %v3714_v31, 2  ;;  %v1453_v33 = vrot.slane %v3766_v11, 2  ;;  %v1454_v34 = vrot.slane %v3769_v17, 2 }
  0x34   : > { %2946 = vmatmul.mubr.msk.f32.gmra.mrb[6].mxu0 %vm261_vm1, %v3610_v42  ;;  %2845 = vmatmul.mubr.msk.f32.gmra.mrb[8].mxu1 %vm261_vm1, %v3557_v28  ;;  %v3755_v60 = vsel %vm770_vm3, %v797_v41, %v799_v49  ;;  %v526_v49 = vrot.slane %v3632_v48, 1 }
  0x35   : > { %2962 = vmatprep.mubr.msk.f32.mxu0 %vm261_vm1, %v3613_v43  ;;  %2847 = vmatprep.mubr.msk.f32.mxu1 %vm261_vm1, %v3616_v44  ;;  %v3785_v20 = vsel %vm770_vm3, %v806_v63, %v807_v3  ;;  %v3805_v41 = vsel %vm770_vm3, %v1453_v33, %v1454_v34  ;;  %v530_v63 = vrot.slane %v3650_v56, 1  ;;  %v535_v33 = vrot.slane %v3683_v14, 1 }
  0x38   : > { %2963 = vmatmul.mubr.msk.f32.vlgmr.msra.gmra.mrb[0].mxu0 %vm261_vm1, %v3629_v47  ;;  %2848 = vmatmul.mubr.msk.f32.gmra.mrb[10].mxu1 %vm261_vm1, %v3632_v48 }
  0x39   : > { %2987 = vmatpush3.msk.msra.mxu0 %vm310_vm0, %v2614_v29  ;;  %2965 = vmatprep.mubr.msk.f32.mxu0 %vm261_vm1, %v3636_v50  ;;  %v3711_v29 = vsel %vm770_vm3, %v787_v52, %v789_v61  ;;  %v801_v52 = vrot.slane %v3650_v56, 2  ;;  %v804_v61 = vrot.slane %v218_v57, 2 }
  0x3a   : > { %2850 = vmatprep.mubr.msk.f32.mxu1 %vm261_vm1, %v3650_v56  ;;  %3012 = vmatprep.subr.msk.mxu0 %vm310_vm0, %v3643_v53 }
  0x3b   : > { %v3760_v62 = vsel %vm770_vm3, %v801_v52, %v802_v55 }
  0x3c   : > { %2966 = vmatmul.mubr.msk.f32.gmra.mrb[2].mxu0 %vm261_vm1, %v3669_v0  ;;  %2851 = vmatmul.mubr.msk.f32.gmra.mrb[12].mxu1 %vm261_vm1, %v3672_v2 }
  0x3d   : > { %2968 = vmatprep.mubr.msk.f32.mxu0 %vm261_vm1, %v3680_v12  ;;  %2853 = vmatprep.mubr.msk.f32.mxu1 %vm261_vm1, %v3683_v14 }
  0x40   : > { %2969 = vmatmul.mubr.msk.f32.gmra.mrb[4].mxu0 %vm261_vm1, %v3711_v29  ;;  %2854 = vmatmul.mubr.msk.f32.gmra.mrb[14].mxu1 %vm261_vm1, %v3714_v31 }
  0x41   : > { %2971 = vmatprep.mubr.msk.f32.mxu0 %vm261_vm1, %v3719_v37  ;;  %2858 = vmatprep.mubr.msk.f32.mxu1 %vm261_vm1, %v502_v39  ;;  %v3790_v39 = vld [vmem:[%s3488_s6 + $0xd0] sm:$0x3]  ;;  %s2505_s6 = sshll.u32 %s185_s29, 7 }
  0x42   : > { %v1456_v40 = vrot.slane %v3790_v39, 2  ;;  %s4062_s7 = scalar_lea.vmem [#allocation3], %s2505_s6 }
  0x43   : > { %s2415_s10 = sshll.u32 %s4062_s7, 4  ;;  %s4099_s10 = int_to_ptr.vmem [resolvable:$true] %s2415_s10 }
  0x44   : > { %2972 = vmatmul.mubr.msk.f32.gmra.mrb[6].mxu0 %vm261_vm1, %v3733_v35  ;;  %2859 = vmatmul.mubr.msk.f32.vlgmr.msra.gmra.mrb[0].mxu1 %vm261_vm1, %v504_v46  ;;  %v525_v46 = vrot.slane %v3616_v44, 1  ;;  %v3818_v52 = vsel %vm770_vm3, %v1454_v34, %v1456_v40  ;;  %v536_v34 = vrot.slane %v3714_v31, 1  ;;  %s3269_s27 = scalar_lea.vmem %s4099_s10, 2048  ;;  %p3276_p4 = scmp.lt.s32.totalorder %s4099_s10, %s3274_s4 }
  0x45   : > { %2974 = vmatprep.mubr.msk.f32.mxu0 %vm261_vm1, %v3737_v51  ;;  %2861 = vmatprep.mubr.msk.f32.mxu1 %vm261_vm1, %v3532_v19  ;;  %v809_v19 = vrot.slane %v221_v10, 2  ;;  %p3270_p0 = scmp.ne.s32.totalorder %s4099_s10, %s3269_s27  ;;  %p3277_p5 = scmp.lt.s32.totalorder %s3275_s5, %s3269_s27 }
  0x46   : > { %2883 = vmatpush3.msk.msra.mxu1 %vm310_vm0, %v3510_v9  ;;  %v3782_v9 = vsel %vm770_vm3, %v802_v55, %v804_v61  ;;  %v528_v55 = vrot.slane %v215_v45, 1  ;;  %v3821_v61 = vsel %vm499_vm2, %v525_v46, %v526_v49  ;;  %v2650_v46 = vld [vmem:[%s4158_s1 + $0x20] sm:$0xf]  ;;  %v3860_v26 = vsel %vm499_vm2, %v535_v33, %v536_v34 }
  0x47   : > { %2908 = vmatprep.subr.msk.mxu1 %vm310_vm0, %v3748_v59  ;;  %p3271_p1 = pnand %p3270_p0, %p3439_p3  ;;  %p3278_p6 = por %p3277_p5, %p3276_p4 }
  0x48   : > { %2975 = vmatmul.mubr.msk.f32.gmra.mrb[8].mxu0 %vm261_vm1, %v3755_v60  ;;  %2862 = vmatmul.mubr.msk.f32.gmra.mrb[2].mxu1 %vm261_vm1, %v3547_v24  ;;  %v3801_v24 = vsel %vm770_vm3, %v807_v3, %v809_v19  ;;  %v531_v3 = vrot.slane %v3672_v2, 1  ;;  %v3834_v45 = vsel %vm499_vm2, %v526_v49, %v528_v55  ;;  %v533_v19 = vrot.slane %v218_v57, 1 }
  0x49   : > { %2977 = vmatprep.mubr.msk.f32.mxu0 %vm261_vm1, %v3760_v62  ;;  %2864 = vmatprep.mubr.msk.f32.mxu1 %vm261_vm1, %v3550_v25  ;;  %v538_v49 = vrot.slane %v221_v10, 1  ;;  %v771_v55 = vrot.slane %v3491_v4, 2  ;;  %p3272_p2 = pneg %p3271_p1 }
  0x4a   : > { %v3839_v40 = vsel %vm499_vm2, %v530_v63, %v531_v3  ;;  %v3853_v57 = vsel %vm499_vm2, %v531_v3, %v533_v19  ;;  %v772_v63 = vrot.slane %v3494_v5, 2  ;;  %v774_v5 = vrot.slane %v3686_v15, 2 }
  0x4b   : > { %v3872_v4 = vsel %vm499_vm2, %v536_v34, %v538_v49  ;;  %p3279_p7 = pnand %p3278_p6, %p3272_p2 }
  0x4c   : > { %2978 = vmatmul.mubr.msk.f32.gmra.mrb[10].mxu0 %vm261_vm1, %v3782_v9  ;;  %2865 = vmatmul.mubr.msk.f32.gmra.mrb[4].mxu1 %vm261_vm1, %v3570_v30  ;;  %v775_v10 = vsel %vm770_vm3, %v772_v63, %v774_v5 }
  0x4d   : > { %2980 = vmatprep.mubr.msk.f32.mxu0 %vm261_vm1, %v3785_v20  ;;  %2867 = vmatprep.mubr.msk.f32.mxu1 %vm261_vm1, %v3576_v32 }
  0x50   : > { %2981 = vmatmul.mubr.msk.f32.gmra.mrb[12].mxu0 %vm261_vm1, %v3801_v24  ;;  %2868 = vmatmul.mubr.msk.f32.gmra.mrb[6].mxu1 %vm261_vm1, %v3593_v36 }
  0x51   : > { %2983 = vmatprep.mubr.msk.f32.mxu0 %vm261_vm1, %v3805_v41  ;;  %2870 = vmatprep.mubr.msk.f32.mxu1 %vm261_vm1, %v3597_v38 }
  0x54   : > { %2984 = vmatmul.mubr.msk.f32.gmra.mrb[14].mxu0 %vm261_vm1, %v3818_v52  ;;  %2871 = vmatmul.mubr.msk.f32.gmra.mrb[8].mxu1 %vm261_vm1, %v3610_v42 }
  0x55   : > { %2988 = vmatprep.mubr.msk.f32.mxu0 %vm261_vm1, %v3505_v8  ;;  %2873 = vmatprep.mubr.msk.f32.mxu1 %vm261_vm1, %v3821_v61 }
  0x58   : > { %2989 = vmatmul.mubr.msk.f32.vlgmr.msra.gmra.mrb[0].mxu0 %vm261_vm1, %v3518_v13  ;;  %2874 = vmatmul.mubr.msk.f32.gmra.mrb[10].mxu1 %vm261_vm1, %v3834_v45 }
  0x59   : > { %3013 = vmatpush3.msk.msra.mxu0 %vm310_vm0, %v3643_v53  ;;  %2991 = vmatprep.mubr.msk.f32.mxu0 %vm261_vm1, %v3529_v18  ;;  %v773_v53 = vsel %vm770_vm3, %v771_v55, %v772_v63 }
  0x5a   : > { %2876 = vmatprep.mubr.msk.f32.mxu1 %vm261_vm1, %v3839_v40  ;;  %3038 = vmatprep.subr.msk.mxu0 %vm310_vm0, %v2650_v46 }
  0x5c   : > { %2992 = vmatmul.mubr.msk.f32.gmra.mrb[2].mxu0 %vm261_vm1, %v3536_v21  ;;  %2877 = vmatmul.mubr.msk.f32.gmra.mrb[12].mxu1 %vm261_vm1, %v3853_v57 }
  0x5d   : > { %2994 = vmatprep.mubr.msk.f32.mxu0 %vm261_vm1, %v3554_v27  ;;  %2879 = vmatprep.mubr.msk.f32.mxu1 %vm261_vm1, %v3860_v26 }
  0x60   : > { %2995 = vmatmul.mubr.msk.f32.gmra.mrb[4].mxu0 %vm261_vm1, %v3557_v28  ;;  %2880 = vmatmul.mubr.msk.f32.gmra.mrb[14].mxu1 %vm261_vm1, %v3872_v4 }
  0x61   : > { %2997 = vmatprep.mubr.msk.f32.mxu0 %vm261_vm1, %v3616_v44  ;;  %2884 = vmatprep.mubr.msk.f32.mxu1 %vm261_vm1, %v773_v53 }
  0x64   : > { %2998 = vmatmul.mubr.msk.f32.gmra.mrb[6].mxu0 %vm261_vm1, %v3632_v48  ;;  %2885 = vmatmul.mubr.msk.f32.vlgmr.msra.gmra.mrb[0].mxu1 %vm261_vm1, %v775_v10 }
  0x65   : > { %3000 = vmatprep.mubr.msk.f32.mxu0 %vm261_vm1, %v3650_v56  ;;  %2887 = vmatprep.mubr.msk.f32.mxu1 %vm261_vm1, %v3613_v43 }
  0x66   : > { %2909 = vmatpush3.msk.msra.mxu1 %vm310_vm0, %v3748_v59 }
  0x67   : > { %3064 = vmatprep.subr.msk.mxu1 %vm310_vm0, %v3468_v1 }
  0x68   : > { %3001 = vmatmul.mubr.msk.f32.gmra.mrb[8].mxu0 %vm261_vm1, %v3672_v2  ;;  %2888 = vmatmul.mubr.msk.f32.gmra.mrb[2].mxu1 %vm261_vm1, %v3629_v47  ;;  %v4055_v47 = vld [vmem:[%s4159_s2] ss:$0 sm:$0xff] }
  0x69   : > { %3003 = vmatprep.mubr.msk.f32.mxu0 %vm261_vm1, %v3683_v14  ;;  %2890 = vmatprep.mubr.msk.f32.mxu1 %vm261_vm1, %v3636_v50 }
  0x6c   : > { %3004 = vmatmul.mubr.msk.f32.gmra.mrb[10].mxu0 %vm261_vm1, %v3714_v31  ;;  %2891 = vmatmul.mubr.msk.f32.gmra.mrb[4].mxu1 %vm261_vm1, %v3669_v0 }
  0x6d   : > { %3006 = vmatprep.mubr.msk.f32.mxu0 %vm261_vm1, %v3766_v11  ;;  %2893 = vmatprep.mubr.msk.f32.mxu1 %vm261_vm1, %v3680_v12 }
  0x70   : > { %3007 = vmatmul.mubr.msk.f32.gmra.mrb[12].mxu0 %vm261_vm1, %v3769_v17  ;;  %2894 = vmatmul.mubr.msk.f32.gmra.mrb[6].mxu1 %vm261_vm1, %v3711_v29 }
  0x71   : > { %3009 = vmatprep.mubr.msk.f32.mxu0 %vm261_vm1, %v3646_v54  ;;  %2896 = vmatprep.mubr.msk.f32.mxu1 %vm261_vm1, %v3719_v37 }
  0x74   : > { %3010 = vmatmul.mubr.msk.f32.gmra.mrb[14].mxu0 %vm261_vm1, %v3654_v58  ;;  %2897 = vmatmul.mubr.msk.f32.gmra.mrb[8].mxu1 %vm261_vm1, %v3733_v35 }
  0x75   : > { %3014 = vmatprep.mubr.msk.f32.mxu0 %vm261_vm1, %v3550_v25  ;;  %2899 = vmatprep.mubr.msk.f32.mxu1 %vm261_vm1, %v3737_v51  ;;  %v1246_v25 = vrot.slane %v3766_v11, 1 }
  0x78   : > { %3015 = vmatmul.mubr.msk.f32.vlgmr.msra.gmra.mrb[0].mxu0 %vm261_vm1, %v3570_v30  ;;  %2900 = vmatmul.mubr.msk.f32.gmra.mrb[10].mxu1 %vm261_vm1, %v3755_v60  ;;  %v1247_v30 = vrot.slane %v3769_v17, 1 }
  0x79   : > { %3039 = vmatpush3.msk.msra.mxu0 %vm310_vm0, %v2650_v46  ;;  %3017 = vmatprep.mubr.msk.f32.mxu0 %vm261_vm1, %v3576_v32 }
  0x7a   : > { %2902 = vmatprep.mubr.msk.f32.mxu1 %vm261_vm1, %v3760_v62 }
  0x7c   : > { %3018 = vmatmul.mubr.msk.f32.gmra.mrb[2].mxu0 %vm261_vm1, %v3593_v36  ;;  %2903 = vmatmul.mubr.msk.f32.gmra.mrb[12].mxu1 %vm261_vm1, %v3782_v9 }
  0x7d   : > { %3020 = vmatprep.mubr.msk.f32.mxu0 %vm261_vm1, %v3597_v38  ;;  %2905 = vmatprep.mubr.msk.f32.mxu1 %vm261_vm1, %v3785_v20 }
  0x80   : > { %3021 = vmatmul.mubr.msk.f32.gmra.mrb[4].mxu0 %vm261_vm1, %v3610_v42  ;;  %2906 = vmatmul.mubr.msk.f32.gmra.mrb[14].mxu1 %vm261_vm1, %v3801_v24 }
  0x81   : > { %3023 = vmatprep.mubr.msk.f32.mxu0 %vm261_vm1, %v3821_v61  ;;  %2910 = vmatprep.mubr.msk.f32.mxu1 %vm261_vm1, %v3497_v6  ;;  %v1249_v6 = vrot.slane %v3790_v39, 1 }
  0x84   : > { %3024 = vmatmul.mubr.msk.f32.gmra.mrb[6].mxu0 %vm261_vm1, %v3834_v45  ;;  %2911 = vmatmul.mubr.msk.f32.vlgmr.msra.gmra.mrb[0].mxu1 %vm261_vm1, %v3502_v7  ;;  %v1250_v7 = vsel %vm499_vm2, %v1247_v30, %v1249_v6 }
  0x85   : > { %3026 = vmatprep.mubr.msk.f32.mxu0 %vm261_vm1, %v3839_v40  ;;  %2913 = vmatprep.mubr.msk.f32.mxu1 %vm261_vm1, %v3505_v8  ;;  %v4164_v8 = vld [vmem:[#allocation6_spill] sm:$0xff] }
  0x86   : > { %3065 = vmatpush3.msk.msra.mxu1 %vm310_vm0, %v3468_v1  ;;  %v1248_v1 = vsel %vm499_vm2, %v1246_v25, %v1247_v30 }
  0x88   : > { %3027 = vmatmul.mubr.msk.f32.gmra.mrb[8].mxu0 %vm261_vm1, %v3853_v57  ;;  %2914 = vmatmul.mubr.msk.f32.gmra.mrb[2].mxu1 %vm261_vm1, %v3518_v13 }
  0x89   : > { %3029 = vmatprep.mubr.msk.f32.mxu0 %vm261_vm1, %v3860_v26  ;;  %2916 = vmatprep.mubr.msk.f32.mxu1 %vm261_vm1, %v3529_v18 }
  0x8c   : > { %3030 = vmatmul.mubr.msk.f32.gmra.mrb[10].mxu0 %vm261_vm1, %v3872_v4  ;;  %2917 = vmatmul.mubr.msk.f32.gmra.mrb[4].mxu1 %vm261_vm1, %v3536_v21 }
  0x8d   : > { %3032 = vmatprep.mubr.msk.f32.mxu0 %vm261_vm1, %v1248_v1  ;;  %2919 = vmatprep.mubr.msk.f32.mxu1 %vm261_vm1, %v3554_v27 }
  0x90   : > { %3033 = vmatmul.mubr.msk.f32.gmra.mrb[12].mxu0 %vm261_vm1, %v1250_v7  ;;  %2920 = vmatmul.mubr.msk.f32.gmra.mrb[6].mxu1 %vm261_vm1, %v3557_v28 }
  0x91   : > { %3035 = vmatprep.mubr.msk.f32.mxu0 %vm261_vm1, %v3691_v16  ;;  %2922 = vmatprep.mubr.msk.f32.mxu1 %vm261_vm1, %v3616_v44 }
  0x94   : > { %3036 = vmatmul.mubr.msk.f32.gmra.mrb[14].mxu0 %vm261_vm1, %v3701_v23  ;;  %2923 = vmatmul.mubr.msk.f32.gmra.mrb[8].mxu1 %vm261_vm1, %v3632_v48 }
  0x95   : > { %3040 = vmatprep.mubr.msk.f32.mxu0 %vm261_vm1, %v3636_v50  ;;  %2925 = vmatprep.mubr.msk.f32.mxu1 %vm261_vm1, %v3650_v56 }
  0x98   : > { %3041 = vmatmul.mubr.msk.f32.vlgmr.msra.gmra.mrb[0].mxu0 %vm261_vm1, %v3669_v0  ;;  %2926 = vmatmul.mubr.msk.f32.gmra.mrb[10].mxu1 %vm261_vm1, %v3672_v2 }
  0x99   : > { %3043 = vmatprep.mubr.msk.f32.mxu0 %vm261_vm1, %v3680_v12  ;;  %2928 = vmatprep.mubr.msk.f32.mxu1 %vm261_vm1, %v3683_v14 }
  0x9c   : > { %3044 = vmatmul.mubr.msk.f32.gmra.mrb[2].mxu0 %vm261_vm1, %v3711_v29  ;;  %2929 = vmatmul.mubr.msk.f32.gmra.mrb[12].mxu1 %vm261_vm1, %v3714_v31 }
  0x9d   : > { %3046 = vmatprep.mubr.msk.f32.mxu0 %vm261_vm1, %v3719_v37  ;;  %2931 = vmatprep.mubr.msk.f32.mxu1 %vm261_vm1, %v3766_v11 }
  0xa0   : > { %3047 = vmatmul.mubr.msk.f32.gmra.mrb[4].mxu0 %vm261_vm1, %v3733_v35  ;;  %2932 = vmatmul.mubr.msk.f32.gmra.mrb[14].mxu1 %vm261_vm1, %v3769_v17 }
  0xa1   : > { %3049 = vmatprep.mubr.msk.f32.mxu0 %vm261_vm1, %v3737_v51  ;;  %2948 = vmatprep.mubr.msk.f32.mxu1 %vm261_vm1, %v3821_v61 }
  0xa4   : > { %3050 = vmatmul.mubr.msk.f32.gmra.mrb[6].mxu0 %vm261_vm1, %v3755_v60  ;;  %2949 = vmatmul.mubr.msk.f32.vlgmr.msra.gmra.mrb[8].mxu1 %vm261_vm1, %v3834_v45 }
  0xa5   : > { %3052 = vmatprep.mubr.msk.f32.mxu0 %vm261_vm1, %v3760_v62  ;;  %2951 = vmatprep.mubr.msk.f32.mxu1 %vm261_vm1, %v3839_v40 }
  0xa8   : > { %3053 = vmatmul.mubr.msk.f32.gmra.mrb[8].mxu0 %vm261_vm1, %v3782_v9  ;;  %2952 = vmatmul.mubr.msk.f32.gmra.mrb[10].mxu1 %vm261_vm1, %v3853_v57 }
  0xa9   : > { %3055 = vmatprep.mubr.msk.f32.mxu0 %vm261_vm1, %v3785_v20  ;;  %2954 = vmatprep.mubr.msk.f32.mxu1 %vm261_vm1, %v3860_v26 }
  0xac   : > { %3056 = vmatmul.mubr.msk.f32.gmra.mrb[10].mxu0 %vm261_vm1, %v3801_v24  ;;  %2955 = vmatmul.mubr.msk.f32.gmra.mrb[12].mxu1 %vm261_vm1, %v3872_v4 }
  0xad   : > { %3058 = vmatprep.mubr.msk.f32.mxu0 %vm261_vm1, %v3805_v41  ;;  %2957 = vmatprep.mubr.msk.f32.mxu1 %vm261_vm1, %v1248_v1 }
  0xb0   : > { %3059 = vmatmul.mubr.msk.f32.gmra.mrb[12].mxu0 %vm261_vm1, %v3818_v52  ;;  %2958 = vmatmul.mubr.msk.f32.gmra.mrb[14].mxu1 %vm261_vm1, %v1250_v7 }
  0xb1   : > { %3061 = vmatprep.mubr.msk.f32.mxu0 %vm261_vm1, %v3694_v22 }
  0xb4   : > { %3062 = vmatmul.mubr.msk.f32.gmra.mrb[14].mxu0 %vm261_vm1, %v4164_v8 }
 0x157   : > { %v2912_v13 = vpop.f32.mrb[0].mxu1 }
 0x158   : > { %v1134_v18 = vpop.f32.mrb[1].mxu1 }
 0x15b   : > { %v2915_v21 = vpop.f32.mrb[2].mxu1 }
 0x15c   : > { %v1144_v27 = vpop.f32.mrb[3].mxu1 }
 0x15f   : > { %v2918_v28 = vpop.f32.mrb[4].mxu1 }
 0x160   : > { %v1154_v32 = vpop.f32.mrb[5].mxu1 }
 0x163   : > { %v2921_v36 = vpop.f32.mrb[6].mxu1 }
 0x164   : > { %v1164_v38 = vpop.f32.mrb[7].mxu1 }
 0x16b   : > { %v3042_v42 = vpop.f32.mrb[0].mxu0 }
 0x16c   : > { %v3066_v43 = vadd.f32 %v3042_v42, %v2912_v13  ;;  %v2168_v44 = vpop.f32.mrb[1].mxu0 }
 0x16d   : > { %v3067_v48 = vadd.f32 %v2168_v44, %v1134_v18 }
 0x16e   : > { %v2296_v50 = vmul.f32 0.23570226, %v3066_v43 }
 0x16f   : > { %v2295_v54 = vmul.f32 0.23570226, %v3067_v48  ;;  %v3045_v56 = vpop.f32.mrb[2].mxu0 }
 0x170   : > { %v2319_v58 = vadd.f32 %v4055_v47, %v2296_v50  ;;  %v3068_v0 = vadd.f32 %v3045_v56, %v2915_v21  ;;  %v2178_v2 = vpop.f32.mrb[3].mxu0 }
 0x171   : > { %v2318_v12 = vadd.f32 %v4055_v47, %v2295_v54  ;;  %v3069_v14 = vadd.f32 %v2178_v2, %v1144_v27 }
 0x172   : > { %vm2335_vm4 = vcmp.ge.f32.partialorder %v2319_v58, 0.0  ;;  %v2351_v15 = vmul.f32 0.2, %v2319_v58  ;;  %v2298_v16 = vmul.f32 0.23570226, %v3068_v0 }
 0x173   : > { %vm2334_vm5 = vcmp.ge.f32.partialorder %v2318_v12, 0.0  ;;  %v2350_v22 = vmul.f32 0.2, %v2318_v12  ;;  %v2297_v23 = vmul.f32 0.23570226, %v3069_v14  ;;  %v3048_v26 = vpop.f32.mrb[4].mxu0 }
 0x174   : > { %v2367_v29 = vsel %vm2335_vm4, %v2319_v58, %v2351_v15  ;;  %v2321_v31 = vadd.f32 %v4055_v47, %v2298_v16  ;;  %v3070_v37 = vadd.f32 %v3048_v26, %v2918_v28  ;;  %v2188_v35 = vpop.f32.mrb[5].mxu0 }
 0x175   : > { %2383 = vst [vmem:[%s4062_s7 + $0x8] sm:$0xff] %v2367_v29  ;;  %v2366_v51 = vsel %vm2334_vm5, %v2318_v12, %v2350_v22  ;;  %v2320_v59 = vadd.f32 %v4055_v47, %v2297_v23  ;;  %v3071_v60 = vadd.f32 %v2188_v35, %v1154_v32 }
 0x176   : > { %2382 = vst [vmem:[%s4062_s7] sm:$0xff] %v2366_v51  ;;  %vm2337_vm6 = vcmp.ge.f32.partialorder %v2321_v31, 0.0  ;;  %v2353_v62 = vmul.f32 0.2, %v2321_v31  ;;  %v2300_v11 = vmul.f32 0.23570226, %v3070_v37 }
 0x177   : > { %vm2336_vm7 = vcmp.ge.f32.partialorder %v2320_v59, 0.0  ;;  %v2352_v17 = vmul.f32 0.2, %v2320_v59  ;;  %v2299_v9 = vmul.f32 0.23570226, %v3071_v60  ;;  %v3051_v20 = vpop.f32.mrb[6].mxu0 }
 0x178   : > { %v2369_v39 = vsel %vm2337_vm6, %v2321_v31, %v2353_v62  ;;  %v2323_v24 = vadd.f32 %v4055_v47, %v2300_v11  ;;  %v3072_v41 = vadd.f32 %v3051_v20, %v2921_v36  ;;  %v2950_v52 = vpop.f32.mrb[8].mxu1  ;;  %v2198_v61 = vpop.f32.mrb[7].mxu0 }
 0x179   : > { %2385 = vst [vmem:[%s4062_s7 + $0x18] sm:$0xff] %v2369_v39  ;;  %v2368_v3 = vsel %vm2336_vm7, %v2320_v59, %v2352_v17  ;;  %v2322_v45 = vadd.f32 %v4055_v47, %v2299_v9  ;;  %v3073_v19 = vadd.f32 %v2198_v61, %v1164_v38  ;;  %v1382_v33 = vpop.f32.mrb[9].mxu1 }
 0x17a   : > { %2384 = vst [vmem:[%s4062_s7 + $0x10] sm:$0xff] %v2368_v3  ;;  %vm2339_vm8 = vcmp.ge.f32.partialorder %v2323_v24, 0.0  ;;  %v2355_v34 = vmul.f32 0.2, %v2323_v24  ;;  %v2302_v40 = vmul.f32 0.23570226, %v3072_v41 }
 0x17b   : > { %vm2338_vm9 = vcmp.ge.f32.partialorder %v2322_v45, 0.0  ;;  %v2354_v46 = vmul.f32 0.2, %v2322_v45  ;;  %v2301_v57 = vmul.f32 0.23570226, %v3073_v19  ;;  %v3054_v49 = vpop.f32.mrb[8].mxu0 }
 0x17c   : > { %v2371_v55 = vsel %vm2339_vm8, %v2323_v24, %v2355_v34  ;;  %v2325_v63 = vadd.f32 %v4055_v47, %v2302_v40  ;;  %v3074_v4 = vadd.f32 %v3054_v49, %v2950_v52  ;;  %v2953_v5 = vpop.f32.mrb[10].mxu1  ;;  %v2208_v53 = vpop.f32.mrb[9].mxu0 }
 0x17d   : > { %2387 = vst [vmem:[%s4062_s7 + $0x28] sm:$0xff] %v2371_v55  ;;  %v2370_v10 = vsel %vm2338_vm9, %v2322_v45, %v2354_v46  ;;  %v2324_v25 = vadd.f32 %v4055_v47, %v2301_v57  ;;  %v3075_v30 = vadd.f32 %v2208_v53, %v1382_v33  ;;  %v1392_v6 = vpop.f32.mrb[11].mxu1 }
 0x17e   : > { %2386 = vst [vmem:[%s4062_s7 + $0x20] sm:$0xff] %v2370_v10  ;;  %vm2341_vm10 = vcmp.ge.f32.partialorder %v2325_v63, 0.0  ;;  %v2357_v1 = vmul.f32 0.2, %v2325_v63  ;;  %v2304_v7 = vmul.f32 0.23570226, %v3074_v4 }
 0x17f   : > { %vm2340_vm11 = vcmp.ge.f32.partialorder %v2324_v25, 0.0  ;;  %v2356_v8 = vmul.f32 0.2, %v2324_v25  ;;  %v2303_v13 = vmul.f32 0.23570226, %v3075_v30  ;;  %v3057_v18 = vpop.f32.mrb[10].mxu0 }
 0x180   : > { %v2373_v21 = vsel %vm2341_vm10, %v2325_v63, %v2357_v1  ;;  %v2327_v27 = vadd.f32 %v4055_v47, %v2304_v7  ;;  %v3076_v28 = vadd.f32 %v3057_v18, %v2953_v5  ;;  %v2956_v32 = vpop.f32.mrb[12].mxu1  ;;  %v2218_v36 = vpop.f32.mrb[11].mxu0 }
 0x181   : > { %2389 = vst [vmem:[%s4062_s7 + $0x38] sm:$0xff] %v2373_v21  ;;  %v2372_v38 = vsel %vm2340_vm11, %v2324_v25, %v2356_v8  ;;  %v2326_v42 = vadd.f32 %v4055_v47, %v2303_v13  ;;  %v3077_v43 = vadd.f32 %v2218_v36, %v1392_v6  ;;  %v1402_v44 = vpop.f32.mrb[13].mxu1 }
 0x182   : > { %2388 = vst [vmem:[%s4062_s7 + $0x30] sm:$0xff] %v2372_v38  ;;  %vm2343_vm12 = vcmp.ge.f32.partialorder %v2327_v27, 0.0  ;;  %v2359_v48 = vmul.f32 0.2, %v2327_v27  ;;  %v2306_v50 = vmul.f32 0.23570226, %v3076_v28 }
 0x183   : > { %vm2342_vm13 = vcmp.ge.f32.partialorder %v2326_v42, 0.0  ;;  %v2358_v54 = vmul.f32 0.2, %v2326_v42  ;;  %v2305_v56 = vmul.f32 0.23570226, %v3077_v43  ;;  %v3060_v58 = vpop.f32.mrb[12].mxu0 }
 0x184   : > { %v2375_v0 = vsel %vm2343_vm12, %v2327_v27, %v2359_v48  ;;  %v2329_v2 = vadd.f32 %v4055_v47, %v2306_v50  ;;  %v3078_v12 = vadd.f32 %v3060_v58, %v2956_v32  ;;  %v2959_v14 = vpop.f32.mrb[14].mxu1  ;;  %v2228_v15 = vpop.f32.mrb[13].mxu0 }
 0x185   : > { %2391 = vst [vmem:[%s4062_s7 + $0x48] sm:$0xff] %v2375_v0  ;;  %v2374_v16 = vsel %vm2342_vm13, %v2326_v42, %v2358_v54  ;;  %v2328_v22 = vadd.f32 %v4055_v47, %v2305_v56  ;;  %v3079_v23 = vadd.f32 %v2228_v15, %v1402_v44  ;;  %v1412_v26 = vpop.f32.mrb[15].mxu1 }
 0x186   : > { %2390 = vst [vmem:[%s4062_s7 + $0x40] sm:$0xff] %v2374_v16  ;;  %vm2345_vm14 = vcmp.ge.f32.partialorder %v2329_v2, 0.0  ;;  %v2361_v29 = vmul.f32 0.2, %v2329_v2  ;;  %v2308_v31 = vmul.f32 0.23570226, %v3078_v12 }
 0x187   : > { %vm2344_vm15 = vcmp.ge.f32.partialorder %v2328_v22, 0.0  ;;  %v2360_v37 = vmul.f32 0.2, %v2328_v22  ;;  %v2307_v35 = vmul.f32 0.23570226, %v3079_v23  ;;  %v3063_v51 = vpop.f32.mrb[14].mxu0 }
 0x188   : > { %v2377_v59 = vsel %vm2345_vm14, %v2329_v2, %v2361_v29  ;;  %v2331_v60 = vadd.f32 %v4055_v47, %v2308_v31  ;;  %v3080_v62 = vadd.f32 %v3063_v51, %v2959_v14  ;;  %v2238_v11 = vpop.f32.mrb[15].mxu0 }
 0x189   : > { %2393 = vst [vmem:[%s4062_s7 + $0x58] sm:$0xff] %v2377_v59  ;;  %v2376_v17 = vsel %vm2344_vm15, %v2328_v22, %v2360_v37  ;;  %v2330_v9 = vadd.f32 %v4055_v47, %v2307_v35  ;;  %v3081_v20 = vadd.f32 %v2238_v11, %v1412_v26 }
 0x18a   : > { %2392 = vst [vmem:[%s4062_s7 + $0x50] sm:$0xff] %v2376_v17  ;;  %vm2347_vm0 = vcmp.ge.f32.partialorder %v2331_v60, 0.0  ;;  %v2363_v39 = vmul.f32 0.2, %v2331_v60  ;;  %v2310_v24 = vmul.f32 0.23570226, %v3080_v62 }
 0x18b   : > { %vm2346_vm1 = vcmp.ge.f32.partialorder %v2330_v9, 0.0  ;;  %v2362_v41 = vmul.f32 0.2, %v2330_v9  ;;  %v2309_v52 = vmul.f32 0.23570226, %v3081_v20 }
 0x18c   : > { %v2379_v61 = vsel %vm2347_vm0, %v2331_v60, %v2363_v39  ;;  %v2333_v3 = vadd.f32 %v4055_v47, %v2310_v24 }
 0x18d   : > { %2395 = vst [vmem:[%s4062_s7 + $0x68] sm:$0xff] %v2379_v61  ;;  %v2378_v45 = vsel %vm2346_vm1, %v2330_v9, %v2362_v41  ;;  %v2332_v19 = vadd.f32 %v4055_v47, %v2309_v52 }
 0x18e   : > { %2394 = vst [vmem:[%s4062_s7 + $0x60] sm:$0xff] %v2378_v45  ;;  %vm2349_vm2 = vcmp.ge.f32.partialorder %v2333_v3, 0.0  ;;  %v2365_v33 = vmul.f32 0.2, %v2333_v3 }
 0x18f   : > { %vm2348_vm3 = vcmp.ge.f32.partialorder %v2332_v19, 0.0  ;;  %v2364_v34 = vmul.f32 0.2, %v2332_v19 }
 0x190   : > { %v2381_v40 = vsel %vm2349_vm2, %v2333_v3, %v2365_v33 }
 0x191   : > { %2397 = vst [vmem:[%s4062_s7 + $0x78] sm:$0xff] %v2381_v40  ;;  %v2380_v46 = vsel %vm2348_vm3, %v2332_v19, %v2364_v34 }
 0x192   : > { %2396 = vst [vmem:[%s4062_s7 + $0x70] sm:$0xff] %v2380_v46 }
 0x193   : > { %3282 = shalt.err (!%p3279_p7)
}
 0x194   : > { %s3283_s29 = scalar_lea.hbm %s4097_s21, 2048  ;;  %s3287_s8 = scalar_lea.hbm %s4160_s3, 8192 }
 0x195   : > { %p3284_p9 = scmp.ne.s32.totalorder %s4097_s21, %s3283_s29  ;;  %p3288_p12 = scmp.lt.u32.totalorder %s4097_s21, %s4160_s3 }
 0x196   : > { %p3289_p13 = scmp.lt.u32.totalorder %s3287_s8, %s3283_s29  ;;  %p3291_p1 = scmp.lt.u32.totalorder %s3283_s29, %s4097_s21 }
 0x197   : > { %p3285_p10 = pnand %p3284_p9, %p3439_p3 }
 0x198   : > { %p3290_p0 = por %p3289_p13, %p3288_p12 }
 0x199   : > { %p3286_p11 = pneg %p3285_p10 }
 0x19a   : > { %p3292_p2 = por %p3291_p1, %p3290_p0 }
 0x19c   : > { %p3293_p4 = pnand %p3292_p2, %p3286_p11 }
 0x19e   : > { %3296 = shalt.err (!%p3293_p4)
}
 0x19f   : > { %s3366_s16 = smov 128   ;;  %s3367_s11 = smov 8  }
 0x1a0   : > { %3196 = dma.vmem_to_hbm [thread:$0]  (%p3439_p3), %s4099_s10, 2048, %s4097_s21, %s4105_s24, %s3366_s16, %s3366_s16, %s3367_s11  }
 0x1a1 PF: > { %p3202_p5 = scmp.ge.s32.totalorder %s3363_s19, 2  ;;  %s2430_s20 = sand.u32 1, %s3335_s12  }
 0x1a2   : > { %s2431_s27 = scalar_lea.sflag [#allocation4], %s2430_s20 }
 0x1a3   : > { %p3199_p6 = pnand %p3202_p5, %p3448_p8 }
 0x1a5   : > { %3330 = dma.done.wait (!%p3199_p6), %s2431_s27, 2048  }
 0x1a6   : > { %3332 = vsyncadd (!%p3199_p6), %s2431_s27, 4294965248  ;;  %s16_s19 = sadd.s32 1, %s3363_s19   ;;  %s4165_s12 = smov %s3339_s13 }
 0x1a7   : > { %p13_p7 = scmp.ge.s32.totalorder %s16_s19, 6   ;;  %s4166_s13 = smov %s3343_s14 }
 0x1a8   : > { %s4167_s14 = smov %s3457_s30  ;;  %s4168_s15 = smov %s3355_s17 }
 0x1a9   : > { %s4169_s16 = smov %s3359_s18  ;;  %s4170_s17 = smov %s4173_s22 }
 0x1aa   : > { %s4171_s18 = smov %s4177_s23  ;;  %15 = sbr.rel (!%p13_p7) target bundleno = 5 (0x5), region = 75 }
 0x1b1   :  { %2436 = vsyncpa [#allocation4], 1 }
 0x1b2   :  { %2438 = vsyncpa [#allocation4 + $0x1], 1 }

</bundles_post_ra>
